<compile_context>
chip_gen: v5e
topology: v5e:2x2
jax: 0.10.0
libtpu: 0.0.40
codegen_flags: <defaults>
</compile_context>

<pallas_src>
import functools

import jax
import jax.numpy as jnp
from jax.experimental import pallas as pl
from jax.experimental.pallas import tpu as pltpu


def _round_up(x: int, m: int) -> int:
    return (x + m - 1) // m * m


def _pick_tile(dim: int, align: int, cap: int, *, force_align: bool = False,
               max_waste: float = 0.10):
    """Choose (tile, padded_dim) with tile dividing padded_dim.

    If the whole dim fits under `cap` it becomes a single tile (unpadded when
    force_align is False: block dim == full array dim is always legal).
    Otherwise pick the largest tile <= cap that is a multiple of `align`
    (preferring multiples of 256 for the 256x256 MXU on v6e/v7x) whose padding
    waste over the minimally aligned size stays below `max_waste`.
    """
    if dim <= cap:
        if force_align:
            p = _round_up(dim, align)
            return p, p
        return dim, dim
    base = _round_up(dim, align)
    limit = int(base * (1.0 + max_waste))
    for step in (256, align):
        if step < align or cap < step or step % align != 0:
            continue
        t = (cap // step) * step
        while t >= step:
            p = _round_up(dim, t)
            if p <= limit:
                return t, p
            t -= step
    return align, base


def _linear_relu_kernel(has_bias, *refs):
    # Single K step: out tile = relu(x_tile @ w_tile (+ b)); no scratch.
    if has_bias:
        x_ref, w_ref, b_ref, o_ref = refs
    else:
        x_ref, w_ref, o_ref = refs
    acc = jnp.dot(x_ref[...], w_ref[...], preferred_element_type=jnp.float32)
    if has_bias:
        acc = acc + b_ref[...].astype(jnp.float32)
    o_ref[...] = jnp.maximum(acc, 0.0).astype(o_ref.dtype)


def _linear_relu_acc_kernel(has_bias, *refs):
    # Multi K step: f32 accumulator resident in VMEM across the K grid axis.
    if has_bias:
        x_ref, w_ref, b_ref, o_ref, acc_ref = refs
    else:
        x_ref, w_ref, o_ref, acc_ref = refs
    k = pl.program_id(2)

    @pl.when(k == 0)
    def _init():
        if has_bias:
            # Fold the bias into the accumulator init (saves a VPU pass later).
            acc_ref[...] = jnp.broadcast_to(
                b_ref[...].astype(jnp.float32), acc_ref.shape)
        else:
            acc_ref[...] = jnp.zeros_like(acc_ref)

    acc_ref[...] += jnp.dot(x_ref[...], w_ref[...],
                            preferred_element_type=jnp.float32)

    @pl.when(k == pl.num_programs(2) - 1)
    def _finalize():
        o_ref[...] = jnp.maximum(acc_ref[...], 0.0).astype(o_ref.dtype)


@functools.partial(
    jax.jit, static_argnames=("tm_cap", "tn_cap", "tk_cap", "use_bf16"))
def basic_block(x, w, b=None, *, tm_cap=512, tn_cap=1024, tk_cap=1024,
                use_bf16=True):
    """relu(x @ w + b).  x: (N, dim_in), w: (dim_in, dim_out), b: (dim_out,)."""
    n, dim_in = x.shape
    k_dim, dim_out = w.shape
    assert k_dim == dim_in, "weight shape must be (dim_in, dim_out)"
    has_bias = b is not None
    out_dtype = x.dtype

    # MXU is bf16-native on v5e/v6e/v7x; keep f32 accumulation + f32 epilogue.
    # TODO(synk): in a real model keep W pre-cast to bf16 outside the hot path.
    compute_dtype = jnp.bfloat16 if use_bf16 else x.dtype
    c_item = jnp.dtype(compute_dtype).itemsize
    o_item = jnp.dtype(out_dtype).itemsize
    m_align = 16 if c_item <= 2 else 8

    # ---- tile / padding selection (minimal padding) ------------------------
    tm, m_pad = _pick_tile(n, m_align, tm_cap, force_align=True)
    tk, k_pad = _pick_tile(dim_in, 128, tk_cap)
    tn, n_pad = _pick_tile(dim_out, 128, tn_cap)

    grid_m, grid_n, grid_k = m_pad // tm, n_pad // tn, k_pad // tk

    # v7x megacore: expose >= 2 (i, j) tiles when the grid collapses to 1x1.
    if grid_m == 1 and grid_n == 1:
        if m_pad >= 256 and (m_pad // 2) % m_align == 0:
            tm, grid_m = m_pad // 2, 2
        elif n_pad >= 256 and n_pad % 256 == 0:
            tn, grid_n = n_pad // 2, 2

    # ---- cast + minimal padding (zeros are benign under relu(x@W+b)) -------
    x_c = x.astype(compute_dtype)
    w_c = w.astype(compute_dtype)
    if m_pad != n or k_pad != dim_in:
        x_c = jnp.pad(x_c, ((0, m_pad - n), (0, k_pad - dim_in)))
    if k_pad != dim_in or n_pad != dim_out:
        w_c = jnp.pad(w_c, ((0, k_pad - dim_in), (0, n_pad - dim_out)))
    operands = [x_c, w_c]
    if has_bias:
        b_c = b.astype(jnp.float32)
        if n_pad != dim_out:
            b_c = jnp.pad(b_c, (0, n_pad - dim_out))
        operands.append(b_c.reshape(1, n_pad))

    # ---- grid spec ----------------------------------------------------------
    if grid_k == 1:
        grid = (grid_m, grid_n)
        x_spec = pl.BlockSpec((tm, tk), lambda i, j: (i, 0))
        w_spec = pl.BlockSpec((tk, tn), lambda i, j: (0, j))
        b_spec = pl.BlockSpec((1, tn), lambda i, j: (0, j))
        o_spec = pl.BlockSpec((tm, tn), lambda i, j: (i, j))
        scratch_shapes = []
        kernel = functools.partial(_linear_relu_kernel, has_bias)
        dim_sem = ("parallel", "parallel")
    else:
        grid = (grid_m, grid_n, grid_k)
        x_spec = pl.BlockSpec((tm, tk), lambda i, j, k: (i, k))
        w_spec = pl.BlockSpec((tk, tn), lambda i, j, k: (k, j))
        b_spec = pl.BlockSpec((1, tn), lambda i, j, k: (0, j))
        o_spec = pl.BlockSpec((tm, tn), lambda i, j, k: (i, j))
        scratch_shapes = [pltpu.VMEM((tm, tn), jnp.float32)]
        kernel = functools.partial(_linear_relu_acc_kernel, has_bias)
        dim_sem = ("parallel", "parallel", "arbitrary")

    in_specs = [x_spec, w_spec] + ([b_spec] if has_bias else [])

    # ---- VMEM budget (double-buffered tiles + f32 accumulator) -------------
    working_set = (2 * tm * tk * c_item
                   + 2 * tk * tn * c_item
                   + 2 * tm * tn * o_item
                   + (2 * tn * 4 if has_bias else 0)
                   + (tm * tn * 4 if grid_k > 1 else 0))
    try:
        vmem_cap = int(pltpu.get_tpu_info().vmem_capacity_bytes)
    except Exception:
        vmem_cap = 64 << 20   # conservative: v7x has 64 MiB per TensorCore
    vmem_limit = max(2 * working_set, 16 << 20)
    vmem_limit = min(vmem_limit, int(vmem_cap * 0.7))
    vmem_limit = max(vmem_limit, working_set + (2 << 20))

    # Truthful memory cost: x is re-read grid_n times, W re-read grid_m times.
    cost = pl.CostEstimate(
        flops=2 * m_pad * k_pad * n_pad,
        transcendentals=0,
        bytes_accessed=(grid_n * m_pad * k_pad * c_item
                        + grid_m * k_pad * n_pad * c_item
                        + (grid_m * n_pad * 4 if has_bias else 0)
                        + m_pad * n_pad * o_item),
    )

    out_p = pl.pallas_call(
        kernel,
        out_shape=jax.ShapeDtypeStruct((m_pad, n_pad), out_dtype),
        grid_spec=pltpu.PrefetchScalarGridSpec(
            num_scalar_prefetch=0,
            grid=grid,
            in_specs=in_specs,
            out_specs=o_spec,
            scratch_shapes=scratch_shapes,
        ),
        compiler_params=pltpu.CompilerParams(
            dimension_semantics=dim_sem,
            vmem_limit_bytes=vmem_limit,
        ),
        cost_estimate=cost,
    )(*operands)

    if m_pad != n or n_pad != dim_out:
        out_p = out_p[:n, :dim_out]
    return out_p


def _reference(x, w, b, use_bf16):
    cd = jnp.bfloat16 if use_bf16 else x.dtype
    acc = jnp.dot(x.astype(cd), w.astype(cd),
                  preferred_element_type=jnp.float32,
                  precision=jax.lax.Precision.HIGHEST)
    if b is not None:
        acc = acc + b.astype(jnp.float32)
    return jnp.maximum(acc, 0.0).astype(x.dtype)


if __name__ == "__main__":
    # --- small shapes consistent with the module (a batch of features) ------
    N, DIM_IN, DIM_OUT = 8, 32, 16
    key = jax.random.PRNGKey(0)
    kx, kw, kb = jax.random.split(key, 3)
    x = jax.random.normal(kx, (N, DIM_IN), dtype=jnp.float32)
    w = jax.random.normal(kw, (DIM_IN, DIM_OUT), dtype=jnp.float32) * 0.1
    b = jax.random.normal(kb, (DIM_OUT,), dtype=jnp.float32) * 0.1

    out = jax.block_until_ready(basic_block(x, w, b))
    ref = _reference(x, w, b, use_bf16=True)
    assert out.shape == (N, DIM_OUT)
    assert jnp.allclose(out, ref, atol=1e-3, rtol=1e-3)

    # --- f32 path + no-bias kernel (bias stream skipped entirely) -----------
    out_f32 = jax.block_until_ready(basic_block(x, w, None, use_bf16=False))
    ref_f32 = _reference(x, w, None, use_bf16=False)
    assert jnp.allclose(out_f32, ref_f32, atol=5e-3, rtol=5e-3)

    # --- ragged shapes: full-dim K/N tiles, no W/b padding, M padded to 16 --
    N2, DIN2, DOUT2 = 520, 700, 900
    k2x, k2w, k2b = jax.random.split(jax.random.PRNGKey(1), 3)
    x2 = jax.random.normal(k2x, (N2, DIN2), dtype=jnp.float32)
    w2 = jax.random.normal(k2w, (DIN2, DOUT2), dtype=jnp.float32) * 0.05
    b2 = jax.random.normal(k2b, (DOUT2,), dtype=jnp.float32) * 0.05
    out2 = jax.block_until_ready(basic_block(x2, w2, b2))
    ref2 = _reference(x2, w2, b2, use_bf16=True)
    assert jnp.allclose(out2, ref2, atol=2e-3, rtol=2e-3)

    # --- force the multi-K accumulator path (grid_k > 1) --------------------
    N3, DIN3, DOUT3 = 256, 1024, 384
    k3x, k3w, k3b = jax.random.split(jax.random.PRNGKey(2), 3)
    x3 = jax.random.normal(k3x, (N3, DIN3), dtype=jnp.float32)
    w3 = jax.random.normal(k3w, (DIN3, DOUT3), dtype=jnp.float32) * 0.03
    b3 = jax.random.normal(k3b, (DOUT3,), dtype=jnp.float32) * 0.03
    out3 = jax.block_until_ready(basic_block(x3, w3, b3, tk_cap=256))
    ref3 = _reference(x3, w3, b3, use_bf16=True)
    assert jnp.allclose(out3, ref3, atol=2e-3, rtol=2e-3)

    print("KERNEL_OK")
</pallas_src>

<mosaic_0001>
module attributes {stable_mosaic.version = 11 : i64} {
  func.func @_linear_relu_kernel(%arg0: i32, %arg1: i32, %arg2: memref<16x32xbf16, #tpu.memory_space<vmem>>, %arg3: memref<32x16xbf16, #tpu.memory_space<vmem>>, %arg4: memref<1x16xf32, #tpu.memory_space<vmem>>, %arg5: memref<16x16xf32, #tpu.memory_space<vmem>>) attributes {dimension_semantics = [#tpu.dimension_semantics<parallel>, #tpu.dimension_semantics<parallel>], iteration_bounds = array<i64: 1, 1>, scalar_prefetch = 0 : i64, scratch_operands = 0 : i64, tpu.core_type = #tpu.core_type<tc>, window_params = [{transform_indices = @transform_0, window_bounds = array<i64: 16, 32>}, {transform_indices = @transform_1, window_bounds = array<i64: 32, 16>}, {transform_indices = @transform_2, window_bounds = array<i64: 1, 16>}, {transform_indices = @transform_3, window_bounds = array<i64: 16, 16>}]} {
    %c0 = arith.constant 0 : index
    %c0_0 = arith.constant 0 : index
    %0 = vector.load %arg2[%c0, %c0_0] : memref<16x32xbf16, #tpu.memory_space<vmem>>, vector<16x32xbf16>
    %c0_1 = arith.constant 0 : index
    %c0_2 = arith.constant 0 : index
    %1 = vector.load %arg3[%c0_1, %c0_2] : memref<32x16xbf16, #tpu.memory_space<vmem>>, vector<32x16xbf16>
    %cst = arith.constant dense<0.000000e+00> : vector<16x16xf32>
    %2 = tpu.matmul %0, %1, %cst {dimension_numbers = #tpu.dot_dimension_numbers<[1], [0], [0], [1], [0, 0, 1, 1], [], []>} : vector<16x32xbf16>, vector<32x16xbf16>, vector<16x16xf32> -> vector<16x16xf32>
    %c0_3 = arith.constant 0 : index
    %c0_4 = arith.constant 0 : index
    %3 = vector.load %arg4[%c0_3, %c0_4] : memref<1x16xf32, #tpu.memory_space<vmem>>, vector<1x16xf32>
    %4 = vector.broadcast %3 : vector<1x16xf32> to vector<16x16xf32>
    %5 = arith.addf %2, %4 : vector<16x16xf32>
    %cst_5 = arith.constant 0.000000e+00 : f32
    %6 = vector.broadcast %cst_5 : f32 to vector<16x16xf32>
    %7 = arith.maximumf %5, %6 : vector<16x16xf32>
    %c0_6 = arith.constant 0 : index
    %c0_7 = arith.constant 0 : index
    %8 = vector.load %arg5[%c0_6, %c0_7] : memref<16x16xf32, #tpu.memory_space<vmem>>, vector<16x16xf32>
    tpu.vector_store %arg5[%c0_6, %c0_7], %7 {strides = array<i32>} : memref<16x16xf32, #tpu.memory_space<vmem>>, vector<16x16xf32>,
    return
  }
  func.func @transform_0(%arg0: i32, %arg1: i32) -> (i32, i32) {
    %c0_i32 = arith.constant 0 : i32
    %c0_i32_0 = arith.constant 0 : i32
    return %arg0, %c0_i32 : i32, i32
  }
  func.func @transform_1(%arg0: i32, %arg1: i32) -> (i32, i32) {
    %c0_i32 = arith.constant 0 : i32
    %c0_i32_0 = arith.constant 0 : i32
    return %c0_i32, %arg1 : i32, i32
  }
  func.func @transform_2(%arg0: i32, %arg1: i32) -> (i32, i32) {
    %c0_i32 = arith.constant 0 : i32
    %c0_i32_0 = arith.constant 0 : i32
    return %c0_i32, %arg1 : i32, i32
  }
  func.func @transform_3(%arg0: i32, %arg1: i32) -> (i32, i32) {
    %c0_i32 = arith.constant 0 : i32
    return %arg0, %arg1 : i32, i32
  }
}

</mosaic_0001>

<bundles_post_ra>
// kernel: basic_block.1
= control target key start
LH: loop header
LB: loop body
LE: loop exit
PB: predicated region body
PF: predicated region fallthrough
CT: control target
= control target key end

     0   :  { %vm42_vm0 = vcmask 261120   ;;  %vm62_vm1 = vcmask 130048   ;;  %s124_s1 = inlined_call_operand.vmem [shape: bf16[32,16], index: 1, kind: input, shape index: {}]   ;;  %s125_s2 = inlined_call_operand.vmem [shape: f32[1,16], index: 2, kind: input, shape index: {}]   ;;  %s126_s0 = inlined_call_operand.vmem [shape: bf16[16,32], index: 0, kind: input, shape index: {}]   ;;  %s127_s3 = inlined_call_operand.vmem [shape: f32[16,16], index: 3, kind: output, shape index: {}]  }
   0x1   :  { %v84_v0 = vld [vmem:[%s124_s1 + $0x8] sm:$0xff]  ;;  %v83_v1 = vld [vmem:[%s124_s1] sm:$0xff] }
   0x2   :  { %52 = vmatpush.bf16.msra.mxu0 %v84_v0  ;;  %v82_v2 = vld [vmem:[%s126_s0] sm:$0xff] }
   0x3   :  { %v85_v3 = vld [vmem:[%s125_s2] ss:$0 sm:$0xff] }
   0x6   :  { %53 = vmatpush.bf16.msra.mxu0 %v83_v1 }
   0x9   :  { %81 = vmatmul.msk.bf16.vlgmr.msra.gmra.mxu0 %vm42_vm0, %v82_v2 }
  0x86   :  { %v55_v4 = vpop.f32.mrf.mxu0 }
  0x87   :  { %v56_v5 = vadd.f32 %v85_v3, %v55_v4 }
  0x89   :  { %v60_v6 = vmax.f32 %v56_v5, 0.0 }
  0x8b   :  { %63 = vst.msk [vmem:[%s127_s3] sm:$0xff] %vm62_vm1, %v60_v6 }
  0x8e   :  { %v57_v7 = vpop.f32.mrf.mxu0 }
  0x8f   :  { %v58_v8 = vadd.f32 %v85_v3, %v57_v7 }
  0x91   :  { %v61_v9 = vmax.f32 %v58_v8, 0.0 }
  0x93   :  { %64 = vst.msk [vmem:[%s127_s3 + $0x8] sm:$0xff] %vm62_vm1, %v61_v9 }

</bundles_post_ra>
